<compile_context>
chip_gen: v7x
topology: tpu7x:2x2x1
jax: 0.10.0
libtpu: 0.0.40
codegen_flags: <defaults>
</compile_context>

<pallas_src>
import jax
import jax.numpy as jnp
from jax import lax
from jax.experimental import pallas as pl
from jax.experimental.pallas import tpu as pltpu

# ---------------- config (matches the nn.Module __init__ assumptions) -------
CATEGORY_NUM = 2          # config.category_num
ANCHOR_NUM = 6            # len(config.anchor_size)
BOX_CODE_SIZE = 6         # config.box_code_size
OUT_SEQ_LEN = 1           # config.only_det == True
CHANNEL = 32              # use_map = use_vis = False -> channel = 32
BN_EPS = 1e-5
MXU_DTYPE = jnp.bfloat16  # MXU operand dtype (accumulate stays f32)


# ---------------- Pallas kernel ----------------------------------------------
def _fused_heads_kernel(p_ref,      # (9C, L)   bf16  im2col^T patches (pixels on lanes)
                        wconv_ref,  # (2C, 9C)  bf16  [cls|loc] fused 3x3 conv weight
                        scale_ref,  # (2C, 1)   f32   folded conv-bias + BN scale
                        shift_ref,  # (2C, 1)   f32   folded conv-bias + BN shift
                        wpt_ref,    # (Cout,2C) bf16  block-diag([w2,w4])^T 1x1 weight
                        bias_ref,   # (Cout,1)  f32
                        out_ref):   # (Cout, L) f32   combined cls|loc output (lane-dense)
    # Fused 3x3 convs of BOTH heads: a single K = 9*C = 288 matmul on the MXU.
    h = jnp.dot(wconv_ref[...], p_ref[...],
                preferred_element_type=jnp.float32)              # (2C, L) f32
    # Folded (conv-bias + BatchNorm) scale/shift, then ReLU -- f32 on the VPU.
    h = jnp.maximum(h * scale_ref[...] + shift_ref[...], 0.0)
    # Fused 1x1 convs of both heads (block-diagonal weight): one more matmul.
    y = jnp.dot(wpt_ref[...], h.astype(wpt_ref.dtype),
                preferred_element_type=jnp.float32) + bias_ref[...]
    # L = nb*H*W is a multiple of 128 -> unmasked lane-dense stores, and no
    # in-kernel reshape (the permute/split happens in the wrapper, where the
    # PyTorch module permutes anyway).
    out_ref[...] = y.astype(out_ref.dtype)


# ---------------- wrapper-side layout helpers --------------------------------
def _im2col_T(x_nhwc):
    """(N, H, W, C) -> (N, 9*C, H*W): transposed im2col for 3x3 / pad=1 conv.

    One fused XLA copy (pad + gather + transpose); replaces the previous
    separate jnp.pad HBM round trip and the 9 per-tap slice copies that were
    materialized inside the kernel.
    """
    N, H, W, C = x_nhwc.shape
    xp = jnp.pad(x_nhwc, ((0, 0), (1, 1), (1, 1), (0, 0)))
    taps = [xp[:, dh:dh + H, dw:dw + W, :]
            for dh in range(3) for dw in range(3)]      # 9 x (N, H, W, C)
    p = jnp.stack(taps, axis=1)                          # (N, 9, H, W, C)
    p = jnp.transpose(p, (0, 1, 4, 2, 3))                # (N, 9, C, H, W)
    return p.reshape(N, 9 * C, H * W)


def _fuse_head_params(p, mxu_dtype=MXU_DTYPE):
    """Fold both heads into single transposed weights for the kernel."""
    C = p["w1"].shape[1]
    Ccls = p["w2"].shape[-1]
    Cloc = p["w4"].shape[-1]
    # Fused 3x3 weight, transposed: rows = [cls out-ch | loc out-ch], cols = (tap, cin).
    w1t = p["w1"].reshape(9 * C, C).T                    # (C, 9C)
    w3t = p["w3"].reshape(9 * C, C).T                    # (C, 9C)
    wconv = jnp.concatenate([w1t, w3t], axis=0).astype(mxu_dtype)     # (2C, 9C)
    # Folded BN scale/shift as column vectors (broadcast along the lane dim).
    scale = jnp.concatenate([p["s1"][0], p["s3"][0]]).reshape(2 * C, 1)
    shift = jnp.concatenate([p["b1"][0], p["b3"][0]]).reshape(2 * C, 1)
    # Block-diagonal fused 1x1 weight, transposed: (Cout, 2C).
    wpt = jnp.zeros((Ccls + Cloc, 2 * C), jnp.float32)
    wpt = wpt.at[:Ccls, :C].set(p["w2"].T)
    wpt = wpt.at[Ccls:, C:].set(p["w4"].T)
    wpt = wpt.astype(mxu_dtype)
    bias = jnp.concatenate([p["b2"][0], p["b4"][0]]).reshape(Ccls + Cloc, 1)
    return dict(wconv=wconv,
                scale=scale.astype(jnp.float32),
                shift=shift.astype(jnp.float32),
                wpt=wpt,
                bias=bias.astype(jnp.float32))


def detection_heads_pallas(x_nhwc, p):
    """x_nhwc: (N, H, W, C) f32.  Returns (cls (N,H,W,Ccls), loc (N,H,W,Cloc))."""
    N, H, W, C = x_nhwc.shape
    HW = H * W
    fp = _fuse_head_params(p)
    Cout = fp["bias"].shape[0]
    Ccls = p["w2"].shape[-1]

    # Transposed im2col patches: (tap, channel) on sublanes, pixels on lanes.
    pt = _im2col_T(x_nhwc).astype(MXU_DTYPE)             # (N, 9C, HW) bf16

    # Group the batch into G grid steps of nb images each.  The whole problem
    # fits VMEM on every generation (v5e/v6e/v7x), so multiple images share a
    # grid step (amortizes the ~0.35us/step overhead); using G=2 steps lets
    # v7x's two TensorCores ("parallel" grid axis) each take half the batch.
    G = 2 if (N >= 2 and N % 2 == 0) else 1
    nb = N // G
    L = nb * HW                                          # lanes per grid step
    pt = pt.reshape(G, nb, 9 * C, HW).transpose(0, 2, 1, 3).reshape(G, 9 * C, L)

    flops = 2 * N * HW * (9 * C * 2 * C + 2 * C * Cout)
    bytes_accessed = (pt.size * 2
                      + fp["wconv"].size * 2 + fp["wpt"].size * 2
                      + (fp["scale"].size + fp["shift"].size + fp["bias"].size) * 4
                      + G * Cout * L * 4)

    grid_spec = pltpu.PrefetchScalarGridSpec(
        num_scalar_prefetch=0,
        grid=(G,),
        in_specs=[
            pl.BlockSpec((None, 9 * C, L), lambda g: (g, 0, 0)),   # patches
            pl.BlockSpec((2 * C, 9 * C), lambda g: (0, 0)),        # wconv (VMEM-resident)
            pl.BlockSpec((2 * C, 1), lambda g: (0, 0)),            # scale
            pl.BlockSpec((2 * C, 1), lambda g: (0, 0)),            # shift
            pl.BlockSpec((Cout, 2 * C), lambda g: (0, 0)),         # wpt
            pl.BlockSpec((Cout, 1), lambda g: (0, 0)),             # bias
        ],
        out_specs=pl.BlockSpec((None, Cout, L), lambda g: (g, 0, 0)),
    )

    out = pl.pallas_call(
        _fused_heads_kernel,
        out_shape=jax.ShapeDtypeStruct((G, Cout, L), jnp.float32),
        grid_spec=grid_spec,
        compiler_params=pltpu.CompilerParams(
            dimension_semantics=("parallel",)),          # image groups are independent
        cost_estimate=pl.CostEstimate(flops=flops, transcendentals=0,
                                      bytes_accessed=bytes_accessed),
    )(pt, fp["wconv"], fp["scale"], fp["shift"], fp["wpt"], fp["bias"])

    # (G, Cout, nb*HW) -> NCHW -> NHWC (the .permute(0,2,3,1) the module does),
    # then split the combined slab into the two heads -- all cheap XLA glue.
    y = out.reshape(G, Cout, nb, HW).transpose(0, 2, 1, 3).reshape(N, Cout, H, W)
    y = jnp.transpose(y, (0, 2, 3, 1))                   # (N, H, W, Cout)
    return y[..., :Ccls], y[..., Ccls:]


# ---------------- module-level forward (heads + PyTorch reshape glue) --------
def fafmimo_heads_forward(x_nchw, params):
    """Reproduces:
        cls_preds = classification(x).permute(0,2,3,1).view(N, -1, category_num)
        loc_preds = regression(x).permute(0,2,3,1)
                       .view(-1, H, W, anchor_num, out_seq_len, box_code_size)
    """
    x_nhwc = jnp.transpose(x_nchw, (0, 2, 3, 1))
    cls_nhwc, loc_nhwc = detection_heads_pallas(x_nhwc, params)
    N, H, W, _ = cls_nhwc.shape
    cls_preds = cls_nhwc.reshape(N, -1, CATEGORY_NUM)
    loc_preds = loc_nhwc.reshape(-1, H, W, ANCHOR_NUM, OUT_SEQ_LEN, BOX_CODE_SIZE)
    return {"loc": loc_preds, "cls": cls_preds}


# ---------------- deterministic parameter construction ----------------------
def make_params(key):
    C = CHANNEL
    Ccls = CATEGORY_NUM * ANCHOR_NUM
    Cloc = ANCHOR_NUM * BOX_CODE_SIZE * OUT_SEQ_LEN
    ks = jax.random.split(key, 12)

    def bn_fold(conv_bias, gamma, beta, mean, var):
        scale = gamma / jnp.sqrt(var + BN_EPS)
        shift = beta + scale * (conv_bias - mean)
        return scale.reshape(1, C), shift.reshape(1, C)

    # Classification head: conv1 3x3 (C->C) + bias, BN(eval), conv2 1x1 (C->Ccls)
    w1 = 0.05 * jax.random.normal(ks[0], (9, C, C), jnp.float32)
    b1c = 0.05 * jax.random.normal(ks[1], (C,), jnp.float32)
    g1 = 1.0 + 0.05 * jax.random.normal(ks[2], (C,), jnp.float32)
    be1 = 0.05 * jax.random.normal(ks[3], (C,), jnp.float32)
    s1, b1 = bn_fold(b1c, g1, be1, jnp.zeros((C,)), jnp.ones((C,)))
    w2 = 0.05 * jax.random.normal(ks[4], (C, Ccls), jnp.float32)
    b2 = (0.05 * jax.random.normal(ks[5], (Ccls,), jnp.float32)).reshape(1, Ccls)

    # Regression head (binary & only_det): conv 3x3 (C->C), BN, ReLU, conv 1x1 (C->Cloc)
    w3 = 0.05 * jax.random.normal(ks[6], (9, C, C), jnp.float32)
    b3c = 0.05 * jax.random.normal(ks[7], (C,), jnp.float32)
    g3 = 1.0 + 0.05 * jax.random.normal(ks[8], (C,), jnp.float32)
    be3 = 0.05 * jax.random.normal(ks[9], (C,), jnp.float32)
    s3, b3 = bn_fold(b3c, g3, be3, jnp.zeros((C,)), jnp.ones((C,)))
    w4 = 0.05 * jax.random.normal(ks[10], (C, Cloc), jnp.float32)
    b4 = (0.05 * jax.random.normal(ks[11], (Cloc,), jnp.float32)).reshape(1, Cloc)

    return dict(w1=w1, s1=s1, b1=b1, w2=w2, b2=b2,
                w3=w3, s3=s3, b3=b3, w4=w4, b4=b4)


# ---------------- pure-JAX reference for sanity checks ------------------------
def _ref_heads(x_nhwc, p, mxu_dtype=jnp.float32):
    """mxu_dtype=float32  -> exact f32 reference.
       mxu_dtype=bfloat16 -> matmul operands cast to bf16 with f32 accumulation,
                             matching the kernel's MXU precision bit-for-bit
                             (up to accumulation order)."""
    C = x_nhwc.shape[-1]
    xd = x_nhwc.astype(mxu_dtype)

    def conv3(x, w9):
        w = w9.reshape(3, 3, C, C).astype(mxu_dtype)
        return lax.conv_general_dilated(
            x, w, (1, 1), "SAME",
            dimension_numbers=("NHWC", "HWIO", "NHWC"),
            preferred_element_type=jnp.float32)

    h1 = jnp.maximum(conv3(xd, p["w1"]) * p["s1"][0] + p["b1"][0], 0.0)
    h3 = jnp.maximum(conv3(xd, p["w3"]) * p["s3"][0] + p["b3"][0], 0.0)
    cls = jnp.einsum("nhwc,ck->nhwk", h1.astype(mxu_dtype),
                     p["w2"].astype(mxu_dtype),
                     preferred_element_type=jnp.float32) + p["b2"][0]
    loc = jnp.einsum("nhwc,ck->nhwk", h3.astype(mxu_dtype),
                     p["w4"].astype(mxu_dtype),
                     preferred_element_type=jnp.float32) + p["b4"][0]
    return cls, loc


if __name__ == "__main__":
    key = jax.random.PRNGKey(0)
    kx, kp = jax.random.split(key)

    # Small decoder-output-shaped feature map (NCHW, like the PyTorch decoder).
    N, C, H, W = 2, CHANNEL, 16, 16
    x_nchw = jax.random.normal(kx, (N, C, H, W), jnp.float32)
    params = make_params(kp)

    result = jax.jit(fafmimo_heads_forward)(x_nchw, params)
    jax.block_until_ready(result)

    x_nhwc = jnp.transpose(x_nchw, (0, 2, 3, 1))
    cls_k, loc_k = detection_heads_pallas(x_nhwc, params)

    # Tight check against a reference that uses the same bf16 MXU-operand
    # precision as the kernel (addresses the "loose tolerance" review note).
    cls_m, loc_m = _ref_heads(x_nhwc, params, mxu_dtype=jnp.bfloat16)
    assert float(jnp.max(jnp.abs(cls_k - cls_m))) < 5e-3
    assert float(jnp.max(jnp.abs(loc_k - loc_m))) < 5e-3

    # Bound against the full-f32 reference (covers bf16 operand rounding).
    cls_r, loc_r = _ref_heads(x_nhwc, params, mxu_dtype=jnp.float32)
    assert float(jnp.max(jnp.abs(cls_k - cls_r))) < 4e-2
    assert float(jnp.max(jnp.abs(loc_k - loc_r))) < 4e-2

    assert result["cls"].shape == (N, H * W * ANCHOR_NUM, CATEGORY_NUM)
    assert result["loc"].shape == (N, H, W, ANCHOR_NUM, OUT_SEQ_LEN, BOX_CODE_SIZE)

    print("KERNEL_OK")
</pallas_src>

<mosaic_0001>
module attributes {stable_mosaic.version = 11 : i64} {
  func.func @_fused_heads_kernel(%arg0: i32, %arg1: memref<1x288x256xbf16, #tpu.memory_space<vmem>>, %arg2: memref<64x288xbf16, #tpu.memory_space<vmem>>, %arg3: memref<64x1xf32, #tpu.memory_space<vmem>>, %arg4: memref<64x1xf32, #tpu.memory_space<vmem>>, %arg5: memref<48x64xbf16, #tpu.memory_space<vmem>>, %arg6: memref<48x1xf32, #tpu.memory_space<vmem>>, %arg7: memref<1x48x256xf32, #tpu.memory_space<vmem>>) attributes {dimension_semantics = [#tpu.dimension_semantics<parallel>], iteration_bounds = array<i64: 2>, scalar_prefetch = 0 : i64, scratch_operands = 0 : i64, tpu.core_type = #tpu.core_type<tc>, window_params = [{transform_indices = @transform_0, window_bounds = array<i64: 1, 288, 256>}, {pipeline_mode = #tpu.pipeline_mode<synchronous>, transform_indices = @transform_1, window_bounds = array<i64: 64, 288>}, {pipeline_mode = #tpu.pipeline_mode<synchronous>, transform_indices = @transform_2, window_bounds = array<i64: 64, 1>}, {pipeline_mode = #tpu.pipeline_mode<synchronous>, transform_indices = @transform_3, window_bounds = array<i64: 64, 1>}, {pipeline_mode = #tpu.pipeline_mode<synchronous>, transform_indices = @transform_4, window_bounds = array<i64: 48, 64>}, {pipeline_mode = #tpu.pipeline_mode<synchronous>, transform_indices = @transform_5, window_bounds = array<i64: 48, 1>}, {transform_indices = @transform_6, window_bounds = array<i64: 1, 48, 256>}]} {
    %c0 = arith.constant 0 : index
    %c0_0 = arith.constant 0 : index
    %0 = vector.load %arg2[%c0, %c0_0] : memref<64x288xbf16, #tpu.memory_space<vmem>>, vector<64x288xbf16>
    %c0_1 = arith.constant 0 : index
    %c0_2 = arith.constant 0 : index
    %c0_3 = arith.constant 0 : index
    %1 = vector.load %arg1[%c0_1, %c0_2, %c0_3] : memref<1x288x256xbf16, #tpu.memory_space<vmem>>, vector<1x288x256xbf16>
    %2 = vector.shape_cast %1 : vector<1x288x256xbf16> to vector<288x256xbf16>
    %cst = arith.constant dense<0.000000e+00> : vector<64x256xf32>
    %3 = tpu.matmul %0, %2, %cst {dimension_numbers = #tpu.dot_dimension_numbers<[1], [0], [0], [1], [0, 0, 1, 1], [], []>} : vector<64x288xbf16>, vector<288x256xbf16>, vector<64x256xf32> -> vector<64x256xf32>
    %c0_4 = arith.constant 0 : index
    %c0_5 = arith.constant 0 : index
    %4 = vector.load %arg3[%c0_4, %c0_5] : memref<64x1xf32, #tpu.memory_space<vmem>>, vector<64x1xf32>
    %5 = vector.broadcast %4 : vector<64x1xf32> to vector<64x256xf32>
    %6 = arith.mulf %3, %5 : vector<64x256xf32>
    %c0_6 = arith.constant 0 : index
    %c0_7 = arith.constant 0 : index
    %7 = vector.load %arg4[%c0_6, %c0_7] : memref<64x1xf32, #tpu.memory_space<vmem>>, vector<64x1xf32>
    %8 = vector.broadcast %7 : vector<64x1xf32> to vector<64x256xf32>
    %9 = arith.addf %6, %8 : vector<64x256xf32>
    %cst_8 = arith.constant 0.000000e+00 : f32
    %10 = vector.broadcast %cst_8 : f32 to vector<64x256xf32>
    %11 = arith.maximumf %9, %10 : vector<64x256xf32>
    %c0_9 = arith.constant 0 : index
    %c0_10 = arith.constant 0 : index
    %12 = vector.load %arg5[%c0_9, %c0_10] : memref<48x64xbf16, #tpu.memory_space<vmem>>, vector<48x64xbf16>
    %13 = arith.truncf %11 : vector<64x256xf32> to vector<64x256xbf16>
    %cst_11 = arith.constant dense<0.000000e+00> : vector<48x256xf32>
    %14 = tpu.matmul %12, %13, %cst_11 {dimension_numbers = #tpu.dot_dimension_numbers<[1], [0], [0], [1], [0, 0, 1, 1], [], []>} : vector<48x64xbf16>, vector<64x256xbf16>, vector<48x256xf32> -> vector<48x256xf32>
    %c0_12 = arith.constant 0 : index
    %c0_13 = arith.constant 0 : index
    %15 = vector.load %arg6[%c0_12, %c0_13] : memref<48x1xf32, #tpu.memory_space<vmem>>, vector<48x1xf32>
    %16 = vector.broadcast %15 : vector<48x1xf32> to vector<48x256xf32>
    %17 = arith.addf %14, %16 : vector<48x256xf32>
    %c0_14 = arith.constant 0 : index
    %c0_15 = arith.constant 0 : index
    %c0_16 = arith.constant 0 : index
    %18 = vector.load %arg7[%c0_14, %c0_15, %c0_16] : memref<1x48x256xf32, #tpu.memory_space<vmem>>, vector<1x48x256xf32>
    %19 = vector.shape_cast %18 : vector<1x48x256xf32> to vector<48x256xf32>
    %20 = vector.shape_cast %17 : vector<48x256xf32> to vector<1x48x256xf32>
    tpu.vector_store %arg7[%c0_14, %c0_15, %c0_16], %20 {strides = array<i32>} : memref<1x48x256xf32, #tpu.memory_space<vmem>>, vector<1x48x256xf32>,
    return
  }
  func.func @transform_0(%arg0: i32) -> (i32, i32, i32) {
    %c0_i32 = arith.constant 0 : i32
    %c0_i32_0 = arith.constant 0 : i32
    %c0_i32_1 = arith.constant 0 : i32
    return %arg0, %c0_i32, %c0_i32_0 : i32, i32, i32
  }
  func.func @transform_1(%arg0: i32) -> (i32, i32) {
    %c0_i32 = arith.constant 0 : i32
    %c0_i32_0 = arith.constant 0 : i32
    %c0_i32_1 = arith.constant 0 : i32
    return %c0_i32, %c0_i32_0 : i32, i32
  }
  func.func @transform_2(%arg0: i32) -> (i32, i32) {
    %c0_i32 = arith.constant 0 : i32
    %c0_i32_0 = arith.constant 0 : i32
    %c0_i32_1 = arith.constant 0 : i32
    return %c0_i32, %c0_i32_0 : i32, i32
  }
  func.func @transform_3(%arg0: i32) -> (i32, i32) {
    %c0_i32 = arith.constant 0 : i32
    %c0_i32_0 = arith.constant 0 : i32
    %c0_i32_1 = arith.constant 0 : i32
    return %c0_i32, %c0_i32_0 : i32, i32
  }
  func.func @transform_4(%arg0: i32) -> (i32, i32) {
    %c0_i32 = arith.constant 0 : i32
    %c0_i32_0 = arith.constant 0 : i32
    %c0_i32_1 = arith.constant 0 : i32
    return %c0_i32, %c0_i32_0 : i32, i32
  }
  func.func @transform_5(%arg0: i32) -> (i32, i32) {
    %c0_i32 = arith.constant 0 : i32
    %c0_i32_0 = arith.constant 0 : i32
    %c0_i32_1 = arith.constant 0 : i32
    return %c0_i32, %c0_i32_0 : i32, i32
  }
  func.func @transform_6(%arg0: i32) -> (i32, i32, i32) {
    %c0_i32 = arith.constant 0 : i32
    %c0_i32_0 = arith.constant 0 : i32
    %c0_i32_1 = arith.constant 0 : i32
    return %arg0, %c0_i32, %c0_i32_0 : i32, i32, i32
  }
}

</mosaic_0001>

<bundles_post_ra>
// kernel: fafmimo_heads_forward.1
= control target key start
LH: loop header
LB: loop body
LE: loop exit
PB: predicated region body
PF: predicated region fallthrough
CT: control target
= control target key end

     0   :  { %s1266_s21 = smov 0   ;;  %s1484_s0 = inlined_call_operand.vmem [shape: bf16[2,288,256], index: 0, kind: input, shape index: {}]   ;;  %s1485_s1 = inlined_call_operand.vmem [shape: bf16[64,288], index: 1, kind: input, shape index: {}]   ;;  %s1486_s2 = inlined_call_operand.vmem [shape: f32[64,1], index: 2, kind: input, shape index: {}]   ;;  %s1487_s3 = inlined_call_operand.vmem [shape: f32[64,1], index: 3, kind: input, shape index: {}]   ;;  %s1488_s4 = inlined_call_operand.vmem [shape: bf16[48,64], index: 4, kind: input, shape index: {}]   ;;  %s1489_s5 = inlined_call_operand.vmem [shape: f32[48,1], index: 5, kind: input, shape index: {}]   ;;  %s1490_s6 = inlined_call_operand.vmem [shape: f32[2,48,256], index: 6, kind: output, shape index: {}]  }
   0x1 LB: > { %s1053_s22 = sadd.s32 4294967295, %s1228_s21   ;;  %p1057_p0 = scmp.ge.s32.totalorder %s1228_s21, 1  ;;  %s1228_s21 = sphi %s1266_s21, %s16_s21  }
   0x2   : > { %p212_p1 = scmp.lt.s32.totalorder %s1228_s21, 3 }
   0x4   : > { %p213_p2 = pnand %p1057_p0, %p212_p1 }
   0x5   : > { %p242_p3 = scmp.lt.s32.totalorder (!%p213_p2), %s1053_s22, 1  ;;  %v1230_v0 = vmov (!%p213_p2), 0   ;;  %v1206_v1 = vld [vmem:[%s1485_s1 + $0x4] ss:$12 sps:$4 sm:$0xff] (!%p213_p2)   ;;  %v1203_v21 = vld [vmem:[%s1485_s1 + $0x8] ss:$12 sps:$4 sm:$0xff] (!%p213_p2)  }
   0x6   : > { %216 = sbr.rel (%p213_p2) target bundleno = 569 (0x239), region = 44  ;;  %663 = vmatprep.mubr.bf16.mxu1 (!%p213_p2), %v1230_v0  ;;  %1147 = vset.pattern.permute.xlu0 (!%p213_p2), %v1230_v0  ;;  %vm545_vm0 = vcmask (!%p213_p2), 261120   ;;  %v704_v22 = vld [vmem:[%s1486_s2] sm:$0xff] (!%p213_p2)  ;;  %v705_v26 = vld [vmem:[%s1486_s2 + $0x8] sm:$0xff] (!%p213_p2)  ;;  %v706_v30 = vld [vmem:[%s1486_s2 + $0x10] sm:$0xff] (!%p213_p2)  ;;  %vm913_vm1 = vcmask (!%p213_p2), 523264  }
   0x7   : > { %1148 = vset.pattern.permute.xlu1 (!%p213_p2), %v1230_v0  ;;  %590 = vmatprep.mubr.bf16.mxu0 (!%p213_p2), %v1206_v1  ;;  %v768_v24 = vld [vmem:[%s1487_s3] sm:$0xff] (!%p213_p2)  ;;  %v769_v27 = vld [vmem:[%s1487_s3 + $0x8] sm:$0xff] (!%p213_p2)  ;;  %v707_v33 = vld [vmem:[%s1486_s2 + $0x18] sm:$0xff] (!%p213_p2) }
   0x8   : > { %714 = vperm.xlu0 (!%p213_p2), %1147, %v704_v22   ;;  %778 = vperm.xlu1 (!%p213_p2), %1148, %v768_v24   ;;  %v1207_v32 = vld [vmem:[%s1485_s1 + $0x20] ss:$12 sps:$4 sm:$0xff] (!%p213_p2)   ;;  %v770_v35 = vld [vmem:[%s1487_s3 + $0x10] sm:$0xff] (!%p213_p2)  ;;  %v771_v36 = vld [vmem:[%s1487_s3 + $0x18] sm:$0xff] (!%p213_p2) }
   0x9   : > { %v708_v39 = vld [vmem:[%s1486_s2 + $0x20] sm:$0xff] (!%p213_p2)  ;;  %v709_v41 = vld [vmem:[%s1486_s2 + $0x28] sm:$0xff] (!%p213_p2)  ;;  %v710_v48 = vld [vmem:[%s1486_s2 + $0x30] sm:$0xff] (!%p213_p2) }
   0xa   : > { %v1211_v40 = vld [vmem:[%s1485_s1 + $0x38] ss:$12 sps:$4 sm:$0xff] (!%p213_p2)   ;;  %v773_v45 = vld [vmem:[%s1487_s3 + $0x28] sm:$0xff] (!%p213_p2)  ;;  %v1215_v49 = vld [vmem:[%s1485_s1 + $0x50] ss:$12 sps:$4 sm:$0xff] (!%p213_p2)  }
   0xb   : > { %v772_v44 = vld [vmem:[%s1487_s3 + $0x20] sm:$0xff] (!%p213_p2)  ;;  %v711_v50 = vld [vmem:[%s1486_s2 + $0x38] sm:$0xff] (!%p213_p2)  ;;  %v774_v53 = vld [vmem:[%s1487_s3 + $0x30] sm:$0xff] (!%p213_p2) }
   0xc   : > { %719 = vperm.xlu0 (!%p213_p2), %1147, %v705_v26   ;;  %783 = vperm.xlu1 (!%p213_p2), %1148, %v769_v27   ;;  %v775_v54 = vld [vmem:[%s1487_s3 + $0x38] sm:$0xff] (!%p213_p2)  ;;  %v862_v57 = vld [vmem:[%s1489_s5] sm:$0xff] (!%p213_p2)  ;;  %v863_v58 = vld [vmem:[%s1489_s5 + $0x8] sm:$0xff] (!%p213_p2) }
   0xd   : > { %s1492_s22 = smov (!%p242_p3, %s1053_s22), 1  ;;  %v864_v60 = vld [vmem:[%s1489_s5 + $0x10] sm:$0xff]  ;;  %v865_v61 = vld [vmem:[%s1489_s5 + $0x18] sm:$0xff]  ;;  %v1204_v62 = vld [vmem:[%s1485_s1] ss:$12 sps:$4 sm:$0xff]  }
   0xe   : > { %s1136_s25 = smul.u32 288, %s1492_s22  ;;  %v1208_v63 = vld [vmem:[%s1485_s1 + $0x1c] ss:$12 sps:$4 sm:$0xff]   ;;  %v866_v1 = vld [vmem:[%s1489_s5 + $0x20] sm:$0xff] }
   0xf   : > { %s1137_s13 = smul.u32 96, %s1492_s22 }
  0x10   : > { %s1286_s28 = scalar_lea.vmem %s1484_s0, %s1136_s25  ;;  %724 = vperm.xlu0 %1147, %v706_v30   ;;  %729 = vperm.xlu1 %1148, %v707_v33  }
  0x11   : > { %v1149_v2 = vld [vmem:[%s1286_s28 + $0x4] ss:$8 sps:$4 sm:$0xff]   ;;  %v1151_v3 = vld [vmem:[%s1286_s28] ss:$8 sps:$4 sm:$0xff]   ;;  %v1152_v4 = vld [vmem:[%s1286_s28 + $0x14] ss:$8 sps:$4 sm:$0xff]   ;;  %s1467_s15 = scalar_lea.vmem %s1490_s6, %s1137_s13 }
  0x12   : > { %558 = vmatprep.subr.bf16.mxu0 %v1149_v2  ;;  %v1154_v5 = vld [vmem:[%s1286_s28 + $0x10] ss:$8 sps:$4 sm:$0xff]   ;;  %v1155_v6 = vld [vmem:[%s1286_s28 + $0x24] ss:$8 sps:$4 sm:$0xff]   ;;  %v1157_v7 = vld [vmem:[%s1286_s28 + $0x20] ss:$8 sps:$4 sm:$0xff]  }
  0x13   : > { %559 = vmatpush1.bf16.msra.mxu0 %v1151_v3  ;;  %v1158_v8 = vld [vmem:[%s1286_s28 + $0x34] ss:$8 sps:$4 sm:$0xff]   ;;  %v1160_v9 = vld [vmem:[%s1286_s28 + $0x30] ss:$8 sps:$4 sm:$0xff]   ;;  %v1161_v10 = vld [vmem:[%s1286_s28 + $0x44] ss:$8 sps:$4 sm:$0xff]  }
  0x14   : > { %560 = vmatprep.subr.bf16.mxu0 %v1152_v4  ;;  %v1163_v11 = vld [vmem:[%s1286_s28 + $0x40] ss:$8 sps:$4 sm:$0xff]   ;;  %v1164_v12 = vld [vmem:[%s1286_s28 + $0x54] ss:$8 sps:$4 sm:$0xff]   ;;  %v1166_v13 = vld [vmem:[%s1286_s28 + $0x50] ss:$8 sps:$4 sm:$0xff]   ;;  %788 = vperm.xlu0 %1147, %v770_v35  }
  0x15   : > { %v1191_v14 = vld [vmem:[%s1286_s28 + $0x104] ss:$8 sps:$4 sm:$0xff]   ;;  %v1193_v15 = vld [vmem:[%s1286_s28 + $0x100] ss:$8 sps:$4 sm:$0xff]   ;;  %v1197_v17 = vld [vmem:[%s1286_s28 + $0x114] ss:$8 sps:$4 sm:$0xff]   ;;  %793 = vperm.xlu1 %1148, %v771_v36  }
  0x16   : > { %v1167_v16 = vld [vmem:[%s1286_s28 + $0x64] ss:$8 sps:$4 sm:$0xff]   ;;  %631 = vmatprep.subr.bf16.mxu1 %v1191_v14  ;;  %v1199_v18 = vld [vmem:[%s1286_s28 + $0x110] ss:$8 sps:$4 sm:$0xff]   ;;  %v1169_v19 = vld [vmem:[%s1286_s28 + $0x60] ss:$8 sps:$4 sm:$0xff]  }
  0x17   : > { %561 = vmatpush1.bf16.msra.mxu0 %v1154_v5  ;;  %632 = vmatpush1.bf16.msra.mxu1 %v1193_v15  ;;  %v1170_v20 = vld [vmem:[%s1286_s28 + $0x74] ss:$8 sps:$4 sm:$0xff]   ;;  %v1172_v23 = vld [vmem:[%s1286_s28 + $0x70] ss:$8 sps:$4 sm:$0xff]   ;;  %v1173_v25 = vld [vmem:[%s1286_s28 + $0x84] ss:$8 sps:$4 sm:$0xff]  }
  0x18   : > { %562 = vmatprep.subr.bf16.mxu0 %v1155_v6  ;;  %633 = vmatprep.subr.bf16.mxu1 %v1197_v17  ;;  %v1175_v28 = vld [vmem:[%s1286_s28 + $0x80] ss:$8 sps:$4 sm:$0xff]   ;;  %v1176_v29 = vld [vmem:[%s1286_s28 + $0x94] ss:$8 sps:$4 sm:$0xff]   ;;  %v1178_v31 = vld [vmem:[%s1286_s28 + $0x90] ss:$8 sps:$4 sm:$0xff]  }
  0x19   : > { %v1179_v34 = vld [vmem:[%s1286_s28 + $0xa4] ss:$8 sps:$4 sm:$0xff]   ;;  %v1181_v37 = vld [vmem:[%s1286_s28 + $0xa0] ss:$8 sps:$4 sm:$0xff]   ;;  %v1182_v38 = vld [vmem:[%s1286_s28 + $0xb4] ss:$8 sps:$4 sm:$0xff]   ;;  %734 = vperm.xlu0 %1147, %v708_v39   ;;  %739 = vperm.xlu1 %1148, %v709_v41  }
  0x1a   : > { %v1184_v42 = vld [vmem:[%s1286_s28 + $0xb0] ss:$8 sps:$4 sm:$0xff]   ;;  %v1185_v43 = vld [vmem:[%s1286_s28 + $0xc4] ss:$8 sps:$4 sm:$0xff]   ;;  %v1187_v46 = vld [vmem:[%s1286_s28 + $0xc0] ss:$8 sps:$4 sm:$0xff]  }
  0x1b   : > { %563 = vmatpush1.bf16.msra.mxu0 %v1157_v7  ;;  %634 = vmatpush1.bf16.msra.mxu1 %v1199_v18  ;;  %v1188_v47 = vld [vmem:[%s1286_s28 + $0xd4] ss:$8 sps:$4 sm:$0xff]   ;;  %v1190_v51 = vld [vmem:[%s1286_s28 + $0xd0] ss:$8 sps:$4 sm:$0xff]   ;;  %v1194_v52 = vld [vmem:[%s1286_s28 + $0xe4] ss:$8 sps:$4 sm:$0xff]  }
  0x1c   : > { %564 = vmatprep.subr.bf16.mxu0 %v1158_v8  ;;  %v1196_v55 = vld [vmem:[%s1286_s28 + $0xe0] ss:$8 sps:$4 sm:$0xff]   ;;  %v1200_v56 = vld [vmem:[%s1286_s28 + $0xf4] ss:$8 sps:$4 sm:$0xff]   ;;  %v1202_v59 = vld [vmem:[%s1286_s28 + $0xf0] ss:$8 sps:$4 sm:$0xff]  }
  0x1d   : > { %798 = vperm.xlu0 %1147, %v772_v44   ;;  %803 = vperm.xlu1 %1148, %v773_v45   ;;  %v867_v2 = vld [vmem:[%s1489_s5 + $0x28] sm:$0xff]  ;;  %v1210_v3 = vld [vmem:[%s1485_s1 + $0x18] ss:$12 sps:$4 sm:$0xff]   ;;  %v1212_v4 = vld [vmem:[%s1485_s1 + $0x34] ss:$12 sps:$4 sm:$0xff]  }
  0x1e   : > { %1108 = vmatmul.mubr.msk.bf16.vlgmr.msra.gmra.mrb[0].mxu1 %vm545_vm0, %v1203_v21  ;;  %v1214_v5 = vld [vmem:[%s1485_s1 + $0x30] ss:$12 sps:$4 sm:$0xff]   ;;  %v1216_v6 = vld [vmem:[%s1485_s1 + $0x4c] ss:$12 sps:$4 sm:$0xff]   ;;  %v1218_v7 = vld [vmem:[%s1485_s1 + $0x48] ss:$12 sps:$4 sm:$0xff]  }
  0x1f   : > { %565 = vmatpush1.bf16.msra.mxu0 %v1160_v9  ;;  %673 = vmatprep.mubr.bf16.mxu1 %v1230_v0 }
  0x20   : > { %566 = vmatprep.subr.bf16.mxu0 %v1161_v10 }
  0x21   : > { %744 = vperm.xlu0 %1147, %v710_v48   ;;  %749 = vperm.xlu1 %1148, %v711_v50  }
  0x23   : > { %567 = vmatpush1.bf16.msra.mxu0 %v1163_v11 }
  0x24   : > { %568 = vmatprep.subr.bf16.mxu0 %v1164_v12 }
  0x25   : > { %808 = vperm.xlu0 %1147, %v774_v53   ;;  %813 = vperm.xlu1 %1148, %v775_v54  }
  0x26   : > { %1109 = vmatmul.mubr.msk.bf16.gmra.mrb[4].mxu1 %vm545_vm0, %v1207_v32 }
  0x27   : > { %569 = vmatpush1.bf16.msra.mxu0 %v1166_v13  ;;  %683 = vmatprep.mubr.bf16.mxu1 %v1230_v0 }
  0x28   : > { %570 = vmatprep.subr.bf16.mxu0 %v1167_v16 }
  0x29   : > { %870 = vperm.xlu0 %1147, %v862_v57   ;;  %875 = vperm.xlu1 %1148, %v863_v58  }
  0x2b   : > { %571 = vmatpush1.bf16.msra.mxu0 %v1169_v19 }
  0x2c   : > { %572 = vmatprep.subr.bf16.mxu0 %v1170_v20 }
  0x2d   : > { %880 = vperm.xlu0 %1147, %v864_v60   ;;  %885 = vperm.xlu1 %1148, %v865_v61  }
  0x2e   : > { %1110 = vmatmul.mubr.msk.bf16.gmra.mrb[8].mxu1 %vm545_vm0, %v1211_v40 }
  0x2f   : > { %573 = vmatpush1.bf16.msra.mxu0 %v1172_v23  ;;  %693 = vmatprep.mubr.bf16.mxu1 %v1230_v0 }
  0x30   : > { %574 = vmatprep.subr.bf16.mxu0 %v1173_v25 }
  0x31   : > { %890 = vperm.xlu0 %1147, %v866_v1   ;;  %895 = vperm.xlu1 %1148, %v867_v2  }
  0x33   : > { %575 = vmatpush1.bf16.msra.mxu0 %v1175_v28 }
  0x34   : > { %576 = vmatprep.subr.bf16.mxu0 %v1176_v29 }
  0x36   : > { %1111 = vmatmul.mubr.msk.bf16.gmra.mrb[12].mxu1 %vm545_vm0, %v1215_v49 }
  0x37   : > { %577 = vmatpush1.bf16.msra.mxu0 %v1178_v31  ;;  %955 = vmatprep.mubr.bf16.mxu1 %v1230_v0 }
  0x38   : > { %578 = vmatprep.subr.bf16.mxu0 %v1179_v34 }
  0x3b   : > { %579 = vmatpush1.bf16.msra.mxu0 %v1181_v37 }
  0x3c   : > { %580 = vmatprep.subr.bf16.mxu0 %v1182_v38 }
  0x3f   : > { %581 = vmatpush1.bf16.msra.mxu0 %v1184_v42 }
  0x40   : > { %582 = vmatprep.subr.bf16.mxu0 %v1185_v43 }
  0x43   : > { %583 = vmatpush1.bf16.msra.mxu0 %v1187_v46 }
  0x44   : > { %584 = vmatprep.subr.bf16.mxu0 %v1188_v47 }
  0x47   : > { %585 = vmatpush1.bf16.msra.mxu0 %v1190_v51 }
  0x48   : > { %586 = vmatprep.subr.bf16.mxu0 %v1194_v52 }
  0x4b   : > { %587 = vmatpush1.bf16.msra.mxu0 %v1196_v55 }
  0x4c   : > { %588 = vmatprep.subr.bf16.mxu0 %v1200_v56 }
  0x4f   : > { %589 = vmatpush1.bf16.msra.mxu0 %v1202_v59 }
  0x52   : > { %591 = vmatmul.mubr.bf16.vlgmr.msra.gmra.mrb[0].mxu0 %v1204_v62 }
  0x53   : > { %600 = vmatprep.mubr.bf16.mxu0 %v1208_v63 }
  0x5a   : > { %601 = vmatmul.mubr.bf16.gmra.mrb[4].mxu0 %v1210_v3 }
  0x5b   : > { %610 = vmatprep.mubr.bf16.mxu0 %v1212_v4 }
  0x62   : > { %611 = vmatmul.mubr.bf16.gmra.mrb[8].mxu0 %v1214_v5 }
  0x63   : > { %620 = vmatprep.mubr.bf16.mxu0 %v1216_v6 }
  0x6a   : > { %621 = vmatmul.mubr.bf16.gmra.mrb[12].mxu0 %v1218_v7 }
  0x87   : > { %v715_v20 = vpop.permute.xlu0 %714  ;;  %v779_v22 = vpop.permute.xlu1 %778 }
  0x8b   : > { %v720_v26 = vpop.permute.xlu0 %719  ;;  %v784_v27 = vpop.permute.xlu1 %783 }
  0x8f   : > { %v725_v28 = vpop.permute.xlu0 %724  ;;  %v730_v29 = vpop.permute.xlu1 %729 }
  0x93   : > { %v789_v38 = vpop.permute.xlu0 %788 }
  0x94   : > { %v794_v43 = vpop.permute.xlu1 %793 }
  0x98   : > { %v735_v53 = vpop.permute.xlu0 %734  ;;  %v740_v62 = vpop.permute.xlu1 %739 }
  0xf1   : > { %v665_v8 = vpop.f32.mrb[0].mxu1 }
  0xf2   : > { %v667_v9 = vpop.f32.mrb[1].mxu1 }
  0xf3   : > { %v669_v10 = vpop.f32.mrb[2].mxu1 }
  0xf4   : > { %v671_v11 = vpop.f32.mrb[3].mxu1 }
  0xf9   : > { %v675_v12 = vpop.f32.mrb[4].mxu1 }
  0xfa   : > { %v677_v13 = vpop.f32.mrb[5].mxu1 }
  0xfb   : > { %v679_v14 = vpop.f32.mrb[6].mxu1 }
  0xfc   : > { %v681_v15 = vpop.f32.mrb[7].mxu1 }
 0x101   : > { %v685_v16 = vpop.f32.mrb[8].mxu1 }
 0x102   : > { %v1431_v17 = vpop.f32.mrb[9].mxu1 }
 0x103   : > { %v1433_v18 = vpop.f32.mrb[10].mxu1 }
 0x104   : > { %v1435_v19 = vpop.f32.mrb[11].mxu1 }
 0x109   : > { %v1437_v21 = vpop.f32.mrb[12].mxu1 }
 0x10a   : > { %v1439_v23 = vpop.f32.mrb[13].mxu1 }
 0x10b   : > { %v1441_v24 = vpop.f32.mrb[14].mxu1 }
 0x10c   : > { %v1443_v25 = vpop.f32.mrb[15].mxu1 }
 0x125   : > { %v592_v30 = vpop.f32.mrb[0].mxu0 }
 0x126   : > { %v666_v31 = vadd.f32 %v665_v8, %v592_v30  ;;  %v594_v32 = vpop.f32.mrb[1].mxu0  ;;  %v799_v8 = vpop.permute.xlu0 %798 }
 0x127   : > { %v668_v33 = vadd.f32 %v667_v9, %v594_v32  ;;  %v596_v34 = vpop.f32.mrb[2].mxu0 }
 0x128   : > { %v752_v35 = vmul.f32 %v715_v20, %v666_v31  ;;  %v670_v36 = vadd.f32 %v669_v10, %v596_v34  ;;  %v598_v37 = vpop.f32.mrb[3].mxu0 }
 0x129   : > { %v753_v39 = vmul.f32 %v715_v20, %v668_v33  ;;  %v672_v40 = vadd.f32 %v671_v11, %v598_v37 }
 0x12a   : > { %v816_v41 = vadd.f32 %v779_v22, %v752_v35  ;;  %v754_v42 = vmul.f32 %v720_v26, %v670_v36  ;;  %v745_v37 = vpop.permute.xlu0 %744 }
 0x12b   : > { %v817_v44 = vadd.f32 %v779_v22, %v753_v39  ;;  %v755_v45 = vmul.f32 %v720_v26, %v672_v40 }
 0x12c   : > { %v818_v46 = vadd.f32 %v784_v27, %v754_v42  ;;  %v832_v49 = vmax.f32 %v816_v41, 0.0 }
 0x12d   : > { %v819_v47 = vadd.f32 %v784_v27, %v755_v45  ;;  %v602_v48 = vpop.f32.mrb[4].mxu0  ;;  %v833_v54 = vmax.f32 %v817_v44, 0.0 }
 0x12e   : > { %v834_v50 = vmax.f32 %v818_v46, 0.0  ;;  %v676_v51 = vadd.f32 %v675_v12, %v602_v48  ;;  %v604_v52 = vpop.f32.mrb[5].mxu0 }
 0x12f   : > { %v835_v55 = vmax.f32 %v819_v47, 0.0  ;;  %v678_v56 = vadd.f32 %v677_v13, %v604_v52  ;;  %v606_v57 = vpop.f32.mrb[6].mxu0  ;;  %v809_v52 = vpop.permute.xlu0 %808 }
 0x130   : > { %v854_v58 = vpack.c.bf16 %v834_v50, %v832_v49  ;;  %v756_v59 = vmul.f32 %v725_v28, %v676_v51  ;;  %v680_v60 = vadd.f32 %v679_v14, %v606_v57  ;;  %v608_v61 = vpop.f32.mrb[7].mxu0  ;;  %v804_v14 = vpop.permute.xlu1 %803 }
 0x131   : > { %v757_v63 = vmul.f32 %v725_v28, %v678_v56  ;;  %v682_v1 = vadd.f32 %v681_v15, %v608_v61  ;;  %v855_v2 = vpack.c.bf16 %v835_v55, %v833_v54 }
 0x132   : > { %v820_v3 = vadd.f32 %v789_v38, %v756_v59  ;;  %v758_v4 = vmul.f32 %v730_v29, %v680_v60 }
 0x133   : > { %v821_v5 = vadd.f32 %v789_v38, %v757_v63  ;;  %v759_v6 = vmul.f32 %v730_v29, %v682_v1  ;;  %923 = vmatprep.subr.bf16.mxu1 %v855_v2 }
 0x134   : > { %v822_v7 = vadd.f32 %v794_v43, %v758_v4  ;;  %924 = vmatpush1.bf16.msra.mxu1 %v854_v58  ;;  %v836_v11 = vmax.f32 %v820_v3, 0.0  ;;  %v750_v40 = vpop.permute.xlu1 %749  ;;  %v1220_v3 = vld [vmem:[%s1488_s4 + $0x8] sm:$0xff]   ;;  %v1221_v4 = vld [vmem:[%s1488_s4 + $0x10] sm:$0xff]  }
 0x135   : > { %v823_v9 = vadd.f32 %v794_v43, %v759_v6  ;;  %v612_v10 = vpop.f32.mrb[8].mxu0  ;;  %v837_v22 = vmax.f32 %v821_v5, 0.0  ;;  %v871_v5 = vpop.permute.xlu0 %870 }
 0x136   : > { %v838_v12 = vmax.f32 %v822_v7, 0.0  ;;  %v686_v13 = vadd.f32 %v685_v16, %v612_v10  ;;  %v614_v20 = vpop.f32.mrb[9].mxu0 }
 0x137   : > { %v839_v26 = vmax.f32 %v823_v9, 0.0  ;;  %v688_v15 = vadd.f32 %v1431_v17, %v614_v20  ;;  %v616_v27 = vpop.f32.mrb[10].mxu0 }
 0x138   : > { %v856_v28 = vpack.c.bf16 %v838_v12, %v836_v11  ;;  %v760_v30 = vmul.f32 %v735_v53, %v686_v13  ;;  %v690_v29 = vadd.f32 %v1433_v18, %v616_v27  ;;  %v618_v31 = vpop.f32.mrb[11].mxu0  ;;  %v814_v58 = vpop.permute.xlu1 %813 }
 0x139   : > { %v761_v32 = vmul.f32 %v735_v53, %v688_v15  ;;  %v692_v33 = vadd.f32 %v1435_v19, %v618_v31  ;;  %v857_v34 = vpack.c.bf16 %v839_v26, %v837_v22  ;;  %v881_v20 = vpop.permute.xlu0 %880 }
 0x13a   : > { %v824_v35 = vadd.f32 %v799_v8, %v760_v30  ;;  %v762_v36 = vmul.f32 %v740_v62, %v690_v29 }
 0x13b   : > { %v825_v16 = vadd.f32 %v799_v8, %v761_v32  ;;  %v763_v38 = vmul.f32 %v740_v62, %v692_v33  ;;  %925 = vmatprep.subr.bf16.mxu1 %v857_v34 }
 0x13c   : > { %v826_v39 = vadd.f32 %v804_v14, %v762_v36  ;;  %926 = vmatpush1.bf16.msra.mxu1 %v856_v28  ;;  %v840_v42 = vmax.f32 %v824_v35, 0.0 }
 0x13d   : > { %v827_v17 = vadd.f32 %v804_v14, %v763_v38  ;;  %v622_v41 = vpop.f32.mrb[12].mxu0  ;;  %v841_v45 = vmax.f32 %v825_v16, 0.0  ;;  %v891_v32 = vpop.permute.xlu0 %890 }
 0x13e   : > { %v842_v43 = vmax.f32 %v826_v39, 0.0  ;;  %v696_v18 = vadd.f32 %v1437_v21, %v622_v41  ;;  %v624_v44 = vpop.f32.mrb[13].mxu0 }
 0x13f   : > { %v843_v46 = vmax.f32 %v827_v17, 0.0  ;;  %v698_v19 = vadd.f32 %v1439_v23, %v624_v44  ;;  %v626_v47 = vpop.f32.mrb[14].mxu0 }
 0x140   : > { %v858_v48 = vpack.c.bf16 %v842_v43, %v840_v42  ;;  %v764_v49 = vmul.f32 %v745_v37, %v696_v18  ;;  %v700_v50 = vadd.f32 %v1441_v24, %v626_v47  ;;  %v628_v51 = vpop.f32.mrb[15].mxu0 }
 0x141   : > { %v765_v53 = vmul.f32 %v745_v37, %v698_v19  ;;  %v702_v54 = vadd.f32 %v1443_v25, %v628_v51  ;;  %v859_v55 = vpack.c.bf16 %v843_v46, %v841_v45  ;;  %v1219_v25 = vld [vmem:[%s1488_s4] sm:$0xff]  }
 0x142   : > { %v828_v56 = vadd.f32 %v809_v52, %v764_v49  ;;  %v766_v57 = vmul.f32 %v750_v40, %v700_v50 }
 0x143   : > { %v829_v21 = vadd.f32 %v809_v52, %v765_v53  ;;  %v767_v59 = vmul.f32 %v750_v40, %v702_v54  ;;  %927 = vmatprep.subr.bf16.mxu1 %v859_v55 }
 0x144   : > { %v830_v60 = vadd.f32 %v814_v58, %v766_v57  ;;  %928 = vmatpush1.bf16.msra.mxu1 %v858_v48  ;;  %v844_v61 = vmax.f32 %v828_v56, 0.0 }
 0x145   : > { %v831_v23 = vadd.f32 %v814_v58, %v767_v59  ;;  %v845_v63 = vmax.f32 %v829_v21, 0.0 }
 0x146   : > { %v846_v62 = vmax.f32 %v830_v60, 0.0 }
 0x147   : > { %v847_v24 = vmax.f32 %v831_v23, 0.0 }
 0x148   : > { %v860_v1 = vpack.c.bf16 %v846_v62, %v844_v61 }
 0x149   : > { %v861_v2 = vpack.c.bf16 %v847_v24, %v845_v63 }
 0x14b   : > { %929 = vmatprep.subr.bf16.mxu1 %v861_v2 }
 0x14c   : > { %930 = vmatpush1.bf16.msra.mxu1 %v860_v1 }
 0x14f   : > { %1115 = vmatmul.mubr.msk.bf16.vlgmr.msra.gmra.mrb[16].mxu1 %vm913_vm1, %v1219_v25 }
 0x150   : > { %965 = vmatprep.mubr.bf16.mxu1 %v1230_v0 }
 0x157   : > { %1116 = vmatmul.mubr.msk.bf16.gmra.mrb[20].mxu1 %vm913_vm1, %v1220_v3 }
 0x158   : > { %975 = vmatprep.mubr.bf16.mxu1 %v1230_v0  ;;  %v876_v0 = vpop.permute.xlu1 %875 }
 0x15c   : > { %v886_v15 = vpop.permute.xlu1 %885 }
 0x15f   : > { %1117 = vmatmul.mubr.msk.bf16.gmra.mrb[24].mxu1 %vm913_vm1, %v1221_v4 }
 0x160   : > { %v896_v36 = vpop.permute.xlu1 %895 }
 0x222   : > { %v957_v6 = vpop.f32.mrb[16].mxu1 }
 0x223   : > { %v958_v7 = vadd.f32 %v957_v6, %v871_v5  ;;  %v959_v8 = vpop.f32.mrb[17].mxu1 }
 0x224   : > { %v960_v9 = vadd.f32 %v959_v8, %v871_v5  ;;  %v961_v10 = vpop.f32.mrb[18].mxu1 }
 0x225   : > { %986 = vst [vmem:[%s1467_s15] sm:$0xff] %v958_v7  ;;  %v962_v11 = vadd.f32 %v961_v10, %v876_v0  ;;  %v963_v12 = vpop.f32.mrb[19].mxu1 }
 0x226   : > { %987 = vst [vmem:[%s1467_s15 + $0x8] sm:$0xff] %v960_v9  ;;  %v964_v13 = vadd.f32 %v963_v12, %v876_v0 }
 0x227   : > { %988 = vst [vmem:[%s1467_s15 + $0x10] sm:$0xff] %v962_v11 }
 0x228   : > { %989 = vst [vmem:[%s1467_s15 + $0x18] sm:$0xff] %v964_v13 }
 0x22a   : > { %v967_v14 = vpop.f32.mrb[20].mxu1 }
 0x22b   : > { %v968_v22 = vadd.f32 %v967_v14, %v881_v20  ;;  %v969_v26 = vpop.f32.mrb[21].mxu1 }
 0x22c   : > { %v970_v27 = vadd.f32 %v969_v26, %v881_v20  ;;  %v971_v28 = vpop.f32.mrb[22].mxu1 }
 0x22d   : > { %990 = vst [vmem:[%s1467_s15 + $0x20] sm:$0xff] %v968_v22  ;;  %v972_v30 = vadd.f32 %v971_v28, %v886_v15  ;;  %v973_v29 = vpop.f32.mrb[23].mxu1 }
 0x22e   : > { %991 = vst [vmem:[%s1467_s15 + $0x28] sm:$0xff] %v970_v27  ;;  %v974_v31 = vadd.f32 %v973_v29, %v886_v15 }
 0x22f   : > { %992 = vst [vmem:[%s1467_s15 + $0x30] sm:$0xff] %v972_v30 }
 0x230   : > { %993 = vst [vmem:[%s1467_s15 + $0x38] sm:$0xff] %v974_v31 }
 0x232   : > { %v977_v33 = vpop.f32.mrb[24].mxu1 }
 0x233   : > { %v978_v34 = vadd.f32 %v977_v33, %v891_v32  ;;  %v979_v35 = vpop.f32.mrb[25].mxu1 }
 0x234   : > { %v980_v37 = vadd.f32 %v979_v35, %v891_v32  ;;  %v981_v16 = vpop.f32.mrb[26].mxu1 }
 0x235   : > { %994 = vst [vmem:[%s1467_s15 + $0x40] sm:$0xff] %v978_v34  ;;  %v982_v38 = vadd.f32 %v981_v16, %v896_v36  ;;  %v983_v39 = vpop.f32.mrb[27].mxu1 }
 0x236   : > { %995 = vst [vmem:[%s1467_s15 + $0x48] sm:$0xff] %v980_v37  ;;  %v984_v40 = vadd.f32 %v983_v39, %v896_v36 }
 0x237   : > { %996 = vst [vmem:[%s1467_s15 + $0x50] sm:$0xff] %v982_v38 }
 0x238   : > { %997 = vst [vmem:[%s1467_s15 + $0x58] sm:$0xff] %v984_v40 }
 0x239 PF: > { %s16_s21 = sadd.s32 1, %s1228_s21  }
 0x23a   : > { %p13_p4 = scmp.ge.s32.totalorder %s16_s21, 4  }
 0x23c   :  { %15 = sbr.rel (!%p13_p4) target bundleno = 1 (0x1), region = 74 }

</bundles_post_ra>
